<compile_context>
chip_gen: v7x
topology: tpu7x:2x2x1
jax: 0.10.0
libtpu: 0.0.40
codegen_flags: <defaults>
</compile_context>

<pallas_src>
import jax
import jax.numpy as jnp
from jax.experimental import pallas as pl
from jax.experimental.pallas import tpu as pltpu


_MAX_DMA_CHUNKS = 4  # a handful of in-flight DMAs is enough to saturate HBM


def _make_dma_copy_kernel(n_chunks, chunk_rows, rows):
    """Grid-less kernel: copy x_ref -> o_ref entirely via HBM->HBM DMA.

    Both refs live in memory_space=pl.ANY (no VMEM staging).  The copy is
    split into `n_chunks` contiguous row chunks; all DMAs are started before
    any wait so several transfers are in flight at once.
    """

    def kernel(x_ref, o_ref, sems):
        copies = []
        for c in range(n_chunks):               # static unroll, static slices
            r0 = c * chunk_rows
            size = min(chunk_rows, rows - r0)
            cp = pltpu.make_async_copy(
                x_ref.at[pl.ds(r0, size)],
                o_ref.at[pl.ds(r0, size)],
                sems.at[c],
            )
            cp.start()
            copies.append(cp)
        for cp in copies:
            cp.wait()

    return kernel


def unflatten(x, flatten_dim, last_channel, *, materialize=False):
    """JAX equivalent of UnFlatten.forward.

    x: any array whose total size is B * last_channel * flatten_dim**2.
    returns: (B, last_channel, flatten_dim, flatten_dim)

    materialize=False (default): pure metadata reshape — exactly what
        torch's .view does; no kernel, no HBM traffic.
    materialize=True: run the Pallas HBM->HBM DMA copy kernel and return a
        freshly materialized buffer (input remains valid / untouched).
    """
    feat = last_channel * flatten_dim * flatten_dim
    total = x.size
    assert total % feat == 0, "input size not divisible by C*H*W"
    b = total // feat
    out_shape = (b, last_channel, flatten_dim, flatten_dim)

    if not materialize:
        # The whole op is a view; reshape is the entire "kernel".
        return jnp.reshape(x, out_shape)

    # --- explicit materializing copy via Pallas (HBM -> HBM DMA) ----------
    x2d = jnp.reshape(x, (b, feat))
    rows = b
    n_chunks = min(_MAX_DMA_CHUNKS, rows)
    chunk_rows = -(-rows // n_chunks)            # ceil div
    n_chunks = -(-rows // chunk_rows)            # actual number of non-empty chunks

    itemsize = jnp.dtype(x2d.dtype).itemsize
    out2d = pl.pallas_call(
        _make_dma_copy_kernel(n_chunks, chunk_rows, rows),
        out_shape=jax.ShapeDtypeStruct((rows, feat), x2d.dtype),
        in_specs=[pl.BlockSpec(memory_space=pl.ANY)],
        out_specs=pl.BlockSpec(memory_space=pl.ANY),
        scratch_shapes=[pltpu.SemaphoreType.DMA((n_chunks,))],
        cost_estimate=pl.CostEstimate(
            flops=0,
            transcendentals=0,
            bytes_accessed=2 * total * itemsize,
        ),
    )(x2d)

    # Metadata-only axis split, same as torch .view (zero-copy).
    return jnp.reshape(out2d, out_shape)


if __name__ == "__main__":
    flatten_dim = 16
    last_channel = 4
    batch = 2

    key = jax.random.PRNGKey(0)
    x = jax.random.normal(
        key, (batch, last_channel * flatten_dim * flatten_dim), dtype=jnp.float32
    )
    ref = jnp.reshape(x, (-1, last_channel, flatten_dim, flatten_dim))

    # Default path: pure view (what torch .view does) — no kernel, no copy.
    out_view = jax.block_until_ready(unflatten(x, flatten_dim, last_channel))

    # Kernel path: explicit materializing copy via HBM->HBM DMA.
    out_copy = jax.block_until_ready(
        unflatten(x, flatten_dim, last_channel, materialize=True)
    )

    for out in (out_view, out_copy):
        assert out.shape == (batch, last_channel, flatten_dim, flatten_dim), out.shape
        assert out.dtype == x.dtype
        assert jnp.array_equal(out, ref)

    # Extra coverage: already-4D input (view(-1, ...) semantics), odd batch
    # (uneven DMA chunking), sub-32-bit dtype — all exact bit copies.
    x2 = jax.random.normal(
        jax.random.PRNGKey(1),
        (3, last_channel, flatten_dim, flatten_dim),
        dtype=jnp.bfloat16,
    )
    ref2 = jnp.reshape(x2, (-1, last_channel, flatten_dim, flatten_dim))
    out2 = jax.block_until_ready(
        unflatten(x2, flatten_dim, last_channel, materialize=True)
    )
    assert out2.shape == ref2.shape and out2.dtype == x2.dtype
    assert jnp.array_equal(out2, ref2)

    print("KERNEL_OK")
</pallas_src>

<mosaic_0001>
module attributes {stable_mosaic.version = 11 : i64} {
  func.func @kernel(%arg0: memref<2x1024xf32, #tpu.memory_space<any>>, %arg1: memref<2x1024xf32, #tpu.memory_space<any>>, %arg2: memref<2x!tpu.dma_semaphore, #tpu.memory_space<semaphore_mem>>) attributes {dimension_semantics = [], scalar_prefetch = 0 : i64, scratch_operands = 1 : i64, tpu.core_type = #tpu.core_type<tc>} {
    %c0_i32 = arith.constant 0 : i32
    %c0_i32_0 = arith.constant 0 : i32
    %c0_i32_1 = arith.constant 0 : i32
    %0 = tpu.memref_slice %arg0[%c0_i32_0, %c0_i32_1] : memref<2x1024xf32, #tpu.memory_space<any>> -> memref<1x1024xf32, #tpu.memory_space<any>>
    %c0_i32_2 = arith.constant 0 : i32
    %c0_i32_3 = arith.constant 0 : i32
    %1 = tpu.memref_slice %arg1[%c0_i32_2, %c0_i32_3] : memref<2x1024xf32, #tpu.memory_space<any>> -> memref<1x1024xf32, #tpu.memory_space<any>>
    %2 = tpu.memref_slice %arg2[%c0_i32] : memref<2x!tpu.dma_semaphore, #tpu.memory_space<semaphore_mem>> -> memref<1x!tpu.dma_semaphore, #tpu.memory_space<semaphore_mem>>
    %3 = tpu.memref_squeeze %2 : memref<1x!tpu.dma_semaphore, #tpu.memory_space<semaphore_mem>> -> memref<!tpu.dma_semaphore, #tpu.memory_space<semaphore_mem>>
    tpu.enqueue_dma source(%0 : memref<1x1024xf32, #tpu.memory_space<any>>) target(%1 : memref<1x1024xf32, #tpu.memory_space<any>>) target_semaphore(%3 : memref<!tpu.dma_semaphore, #tpu.memory_space<semaphore_mem>>)
    %c1_i32 = arith.constant 1 : i32
    %c1_i32_4 = arith.constant 1 : i32
    %c0_i32_5 = arith.constant 0 : i32
    %4 = tpu.memref_slice %arg0[%c1_i32_4, %c0_i32_5] : memref<2x1024xf32, #tpu.memory_space<any>> -> memref<1x1024xf32, #tpu.memory_space<any>>
    %c1_i32_6 = arith.constant 1 : i32
    %c0_i32_7 = arith.constant 0 : i32
    %5 = tpu.memref_slice %arg1[%c1_i32_6, %c0_i32_7] : memref<2x1024xf32, #tpu.memory_space<any>> -> memref<1x1024xf32, #tpu.memory_space<any>>
    %6 = tpu.memref_slice %arg2[%c1_i32] : memref<2x!tpu.dma_semaphore, #tpu.memory_space<semaphore_mem>> -> memref<1x!tpu.dma_semaphore, #tpu.memory_space<semaphore_mem>>
    %7 = tpu.memref_squeeze %6 : memref<1x!tpu.dma_semaphore, #tpu.memory_space<semaphore_mem>> -> memref<!tpu.dma_semaphore, #tpu.memory_space<semaphore_mem>>
    tpu.enqueue_dma source(%4 : memref<1x1024xf32, #tpu.memory_space<any>>) target(%5 : memref<1x1024xf32, #tpu.memory_space<any>>) target_semaphore(%7 : memref<!tpu.dma_semaphore, #tpu.memory_space<semaphore_mem>>)
    %c0_i32_8 = arith.constant 0 : i32
    %c0_i32_9 = arith.constant 0 : i32
    %c0_i32_10 = arith.constant 0 : i32
    %8 = tpu.memref_slice %arg0[%c0_i32_9, %c0_i32_10] : memref<2x1024xf32, #tpu.memory_space<any>> -> memref<1x1024xf32, #tpu.memory_space<any>>
    %c0_i32_11 = arith.constant 0 : i32
    %c0_i32_12 = arith.constant 0 : i32
    %9 = tpu.memref_slice %arg1[%c0_i32_11, %c0_i32_12] : memref<2x1024xf32, #tpu.memory_space<any>> -> memref<1x1024xf32, #tpu.memory_space<any>>
    %10 = tpu.memref_slice %arg2[%c0_i32_8] : memref<2x!tpu.dma_semaphore, #tpu.memory_space<semaphore_mem>> -> memref<1x!tpu.dma_semaphore, #tpu.memory_space<semaphore_mem>>
    %11 = tpu.memref_squeeze %10 : memref<1x!tpu.dma_semaphore, #tpu.memory_space<semaphore_mem>> -> memref<!tpu.dma_semaphore, #tpu.memory_space<semaphore_mem>>
    tpu.wait_dma2 semaphore(%11 : memref<!tpu.dma_semaphore, #tpu.memory_space<semaphore_mem>>) src(%8 : memref<1x1024xf32, #tpu.memory_space<any>>) dst(%9 : memref<1x1024xf32, #tpu.memory_space<any>>)
    %c1_i32_13 = arith.constant 1 : i32
    %c1_i32_14 = arith.constant 1 : i32
    %c0_i32_15 = arith.constant 0 : i32
    %12 = tpu.memref_slice %arg0[%c1_i32_14, %c0_i32_15] : memref<2x1024xf32, #tpu.memory_space<any>> -> memref<1x1024xf32, #tpu.memory_space<any>>
    %c1_i32_16 = arith.constant 1 : i32
    %c0_i32_17 = arith.constant 0 : i32
    %13 = tpu.memref_slice %arg1[%c1_i32_16, %c0_i32_17] : memref<2x1024xf32, #tpu.memory_space<any>> -> memref<1x1024xf32, #tpu.memory_space<any>>
    %14 = tpu.memref_slice %arg2[%c1_i32_13] : memref<2x!tpu.dma_semaphore, #tpu.memory_space<semaphore_mem>> -> memref<1x!tpu.dma_semaphore, #tpu.memory_space<semaphore_mem>>
    %15 = tpu.memref_squeeze %14 : memref<1x!tpu.dma_semaphore, #tpu.memory_space<semaphore_mem>> -> memref<!tpu.dma_semaphore, #tpu.memory_space<semaphore_mem>>
    tpu.wait_dma2 semaphore(%15 : memref<!tpu.dma_semaphore, #tpu.memory_space<semaphore_mem>>) src(%12 : memref<1x1024xf32, #tpu.memory_space<any>>) dst(%13 : memref<1x1024xf32, #tpu.memory_space<any>>)
    return
  }
}

</mosaic_0001>

<bundles_post_ra>
// kernel: tpu_custom_call.1
= control target key start
LH: loop header
LB: loop body
LE: loop exit
PB: predicated region body
PF: predicated region fallthrough
CT: control target
= control target key end

     0   :  { %s78_s6 = smov 32   ;;  %s79_s7 = smov 1   ;;  %s107_s0 = inlined_call_operand.hbm [shape: f32[2,1024], index: 0, kind: input, shape index: {}]   ;;  %s108_s1 = inlined_call_operand.hbm [shape: f32[2,1024], index: 1, kind: output, shape index: {}]  }
   0x1   :  { %18 = sst [smem:[#allocation4]] %s78_s6  ;;  %s80_s8 = smov [#allocation2]  }
   0x2   :  { %20 = sst [smem:[#allocation4 + $0x1]] %s78_s6  ;;  %s81_s9 = smov [#allocation3]  }
   0x3   :  { %22 = sst [smem:[#allocation4 + $0x2]] %s79_s7  ;;  %s82_s10 = smov 0  }
   0x4   :  { %24 = dma.general %s107_s0, 128, %s108_s1, %s80_s8, %s81_s9, [#allocation4], %s82_s10, 0  }
   0x5   :  { %40 = sst [smem:[#allocation6]] %s78_s6  ;;  %s25_s17 = scalar_lea.hbm %s107_s0, 16 }
   0x6   :  { %42 = sst [smem:[#allocation6 + $0x1]] %s78_s6  ;;  %s26_s20 = scalar_lea.hbm %s108_s1, 16 }
   0x7   :  { %44 = sst [smem:[#allocation6 + $0x2]] %s79_s7  ;;  %s83_s21 = smov [#allocation2 + $0x1]  }
   0x8   :  { %s84_s22 = smov [#allocation5]  }
   0x9   :  { %46 = dma.general %s25_s17, 128, %s26_s20, %s83_s21, %s84_s22, [#allocation6], %s82_s10, 0  }
   0xa   :  { %74 = dma.done.wait [#allocation2], 128 }
   0xb   :  { %75 = vsyncadd [#allocation2], 4294967168 }
   0xc   :  { %76 = dma.done.wait [#allocation2 + $0x1], 128 }
   0xd   :  { %77 = vsyncadd [#allocation2 + $0x1], 4294967168 }
   0xe   :  { %52 = vsyncmov [#allocation2] }
  0x11   :  { %s53_s23 = vpop.sfrf %52 }
  0x12   :  { %p65_p0 = scmp.ne.s32.totalorder %s53_s23, 0 }
  0x14   :  { %57 = shalt.err (%p65_p0)  }
  0x15   :  { %59 = vsyncmov [#allocation2 + $0x1] }
  0x18   :  { %s60_s24 = vpop.sfrf %59 }
  0x19   :  { %p66_p1 = scmp.ne.s32.totalorder %s60_s24, 0 }
  0x1b   :  { %64 = shalt.err (%p66_p1)  }

</bundles_post_ra>
